<compile_context>
chip_gen: v7x
topology: tpu7x:2x2x1
jax: 0.10.0
libtpu: 0.0.40
codegen_flags: <defaults>
</compile_context>

<pallas_src>
from functools import partial

import jax
import jax.numpy as jnp
from jax import lax
from jax.experimental import pallas as pl
from jax.experimental.pallas import tpu as pltpu  # noqa: F401  (TPU backend)


def _round_up(n, m):
    return (n + m - 1) // m * m


def _pad2(a, rows, cols):
    r, c = a.shape
    return jnp.pad(a, ((0, rows - r), (0, cols - c)))


# ------------------------- one-time parameter packing ----------------------

def pack_rnn_params(w_ih, w_hh, b_ih, b_hh, w_d, b_d):
    """Pre-transpose, zero-pad to 128 lanes, fuse biases, cast MXU operands to
    bf16.  Call ONCE and reuse; this is deliberately outside the per-call path.
    Padded rows/cols are zero, so padded hidden lanes stay exactly tanh(0)=0
    and never leak into real lanes."""
    f32 = jnp.float32
    H, D = w_ih.shape
    O = w_d.shape[0]
    Hp = _round_up(H, 128)   # lane-dense hidden width (dense vst, full MXU cols)
    Op = _round_up(O, 128)   # lane-dense decode output width

    wih_t = _pad2(jnp.asarray(w_ih.T, f32), D, Hp).astype(jnp.bfloat16)    # (D, Hp)
    whh_t = _pad2(jnp.asarray(w_hh.T, f32), Hp, Hp).astype(jnp.bfloat16)   # (Hp, Hp)
    bias = _pad2((b_ih + b_hh).reshape(1, H).astype(f32), 1, Hp)           # (1, Hp)
    wd_t = _pad2(jnp.asarray(w_d.T, f32), Hp, Op).astype(jnp.bfloat16)     # (Hp, Op)
    bd = _pad2(b_d.reshape(1, O).astype(f32), 1, Op)                       # (1, Op)
    return wih_t, whh_t, bias, wd_t, bd


# ------------------------- fused forward + decode --------------------------

@partial(jax.jit, static_argnames=("tanh_in_bf16",))
def rnn_forward_decode(x, wih_t, whh_t, bias, wd_t, bd, *, tanh_in_bf16=True):
    """x: (L, B, D) f32; packed params from pack_rnn_params.

    Returns (padded, lane-dense outputs; slice off padding lanes if needed):
      hs_p: (L, B, Hp) f32 -- hidden-state sequence (== module.forward(x) in [:H])
      y_p:  (B, Op)    f32 -- decode(hs[-1]) = tanh(hs[-1] @ W_d^T + b_d) in [:O]
    """
    L, B, D = x.shape
    Hp = wih_t.shape[1]
    Op = wd_t.shape[1]
    h_dtype = jnp.bfloat16 if tanh_in_bf16 else jnp.float32

    # (L, B, D) -> (L*B, D) is contiguous: free metadata reshape, no HBM pass.
    x2 = x.reshape(L * B, D)

    def kernel(x_ref, wih_ref, whh_ref, b_ref, wd_ref, bd_ref, hs_ref, y_ref):
        # (1) Hoisted time-parallel input projection with the fused bias,
        #     kept entirely in vregs (no staging through hs_ref).
        z_all = (jnp.dot(x_ref[...].astype(jnp.bfloat16), wih_ref[...],
                         preferred_element_type=jnp.float32)
                 + b_ref[...])                               # (L*B, Hp) f32

        whh = whh_ref[...]                                   # (Hp, Hp) bf16, hoisted

        # (2) Serial recurrence: h_t = tanh(z_t + h_{t-1} @ W_hh^T), h_0 = 0.
        #     Fully unrolled (L is small here); per step: one (B,Hp)x(Hp,Hp)
        #     MXU op + one tanh, with z_t as a static vreg slice and the
        #     hs store off the critical path.  Cap the unroll at large L.
        h = jnp.zeros((B, Hp), h_dtype)
        for t in range(L):
            z_t = z_all[t * B:(t + 1) * B, :]                # (B, Hp) f32, vreg slice
            pre = z_t + jnp.dot(h.astype(jnp.bfloat16), whh,
                                preferred_element_type=jnp.float32)
            h = jnp.tanh(pre.astype(h_dtype))                # bf16 tanh on v6e/v7x
            hs_ref[t] = h.astype(jnp.float32)                # dense 128-lane store

        # (3) Fused decode epilogue: y = tanh(h_L @ W_d^T + b_d).
        y_ref[...] = jnp.tanh(
            jnp.dot(h.astype(jnp.bfloat16), wd_ref[...],
                    preferred_element_type=jnp.float32) + bd_ref[...])

    hs_p, y_p = pl.pallas_call(
        kernel,
        out_shape=(jax.ShapeDtypeStruct((L, B, Hp), jnp.float32),
                   jax.ShapeDtypeStruct((B, Op), jnp.float32)),
        in_specs=[
            pl.BlockSpec((L * B, D), lambda: (0, 0)),   # x (flattened, f32; cast in-kernel)
            pl.BlockSpec((D, Hp), lambda: (0, 0)),      # W_ih^T (padded, bf16)
            pl.BlockSpec((Hp, Hp), lambda: (0, 0)),     # W_hh^T (padded, bf16)
            pl.BlockSpec((1, Hp), lambda: (0, 0)),      # fused bias (f32)
            pl.BlockSpec((Hp, Op), lambda: (0, 0)),     # W_d^T (padded, bf16)
            pl.BlockSpec((1, Op), lambda: (0, 0)),      # b_d (f32)
        ],
        out_specs=(
            pl.BlockSpec((L, B, Hp), lambda: (0, 0, 0)),  # hidden sequence
            pl.BlockSpec((B, Op), lambda: (0, 0)),        # decoded final state
        ),
    )(x2, wih_t, whh_t, bias, wd_t, bd)

    return hs_p, y_p


# ---------------------------- pure-JAX reference ---------------------------

def rnn_forward_ref(x, w_ih, w_hh, b_ih, b_hh):
    def step(h, x_t):
        h_new = jnp.tanh(x_t @ w_ih.T + b_ih + h @ w_hh.T + b_hh)
        return h_new, h_new
    h0 = jnp.zeros((x.shape[1], w_ih.shape[0]), jnp.float32)
    _, hs = jax.lax.scan(step, h0, x)
    return hs


# ----------------------------------- main -----------------------------------

if __name__ == "__main__":
    latent_dim, input_dim, output_dim = 32, 16, 4
    seq_len, batch = 8, 8

    key = jax.random.PRNGKey(0)
    k = jax.random.split(key, 8)
    # PyTorch-style init: U(-1/sqrt(hidden), 1/sqrt(hidden)).
    s = 1.0 / jnp.sqrt(jnp.float32(latent_dim))
    w_ih = jax.random.uniform(k[0], (latent_dim, input_dim), jnp.float32, -s, s)
    w_hh = jax.random.uniform(k[1], (latent_dim, latent_dim), jnp.float32, -s, s)
    b_ih = jax.random.uniform(k[2], (latent_dim,), jnp.float32, -s, s)
    b_hh = jax.random.uniform(k[3], (latent_dim,), jnp.float32, -s, s)
    sd = 1.0 / jnp.sqrt(jnp.float32(latent_dim))
    w_d = jax.random.uniform(k[4], (output_dim, latent_dim), jnp.float32, -sd, sd)
    b_d = jax.random.uniform(k[5], (output_dim,), jnp.float32, -sd, sd)

    x = jax.random.normal(k[6], (seq_len, batch, input_dim), jnp.float32)

    # v5e has no bf16 VPU/EUP: keep the tanh / h carry in f32 there.
    dev_kind = jax.devices()[0].device_kind.lower()
    tanh_in_bf16 = "v5" not in dev_kind

    packed = pack_rnn_params(w_ih, w_hh, b_ih, b_hh, w_d, b_d)   # pack once, reuse

    hs_p, y_p = jax.block_until_ready(
        rnn_forward_decode(x, *packed, tanh_in_bf16=tanh_in_bf16))

    # Lane-padding slice (consumers can keep the padded layout at real sizes).
    hs = hs_p[:, :, :latent_dim]
    y = y_p[:, :output_dim]

    hs_ref = rnn_forward_ref(x, w_ih, w_hh, b_ih, b_hh)
    y_ref = jnp.tanh(hs_ref[-1] @ w_d.T + b_d)

    assert hs.shape == (seq_len, batch, latent_dim)
    assert y.shape == (batch, output_dim)
    # bf16 MXU operands (+ bf16 tanh/carry on v6e/v7x) through an 8-step
    # recurrence -> compare vs the f32 reference at ~5e-2.
    assert jnp.allclose(hs, hs_ref, atol=5e-2, rtol=5e-2), \
        float(jnp.max(jnp.abs(hs - hs_ref)))
    assert jnp.allclose(y, y_ref, atol=5e-2, rtol=5e-2), \
        float(jnp.max(jnp.abs(y - y_ref)))

    print("KERNEL_OK")
</pallas_src>

<mosaic_0001>
module attributes {stable_mosaic.version = 11 : i64} {
  func.func @kernel(%arg0: memref<64x16xf32, #tpu.memory_space<vmem>>, %arg1: memref<16x128xbf16, #tpu.memory_space<vmem>>, %arg2: memref<128x128xbf16, #tpu.memory_space<vmem>>, %arg3: memref<1x128xf32, #tpu.memory_space<vmem>>, %arg4: memref<128x128xbf16, #tpu.memory_space<vmem>>, %arg5: memref<1x128xf32, #tpu.memory_space<vmem>>, %arg6: memref<8x8x128xf32, #tpu.memory_space<vmem>>, %arg7: memref<8x128xf32, #tpu.memory_space<vmem>>) attributes {dimension_semantics = [], scalar_prefetch = 0 : i64, scratch_operands = 0 : i64, tpu.core_type = #tpu.core_type<tc>} {
    %c0 = arith.constant 0 : index
    %c0_0 = arith.constant 0 : index
    %0 = vector.load %arg0[%c0, %c0_0] : memref<64x16xf32, #tpu.memory_space<vmem>>, vector<64x16xf32>
    %1 = arith.truncf %0 : vector<64x16xf32> to vector<64x16xbf16>
    %c0_1 = arith.constant 0 : index
    %c0_2 = arith.constant 0 : index
    %2 = vector.load %arg1[%c0_1, %c0_2] : memref<16x128xbf16, #tpu.memory_space<vmem>>, vector<16x128xbf16>
    %cst = arith.constant dense<0.000000e+00> : vector<64x128xf32>
    %3 = tpu.matmul %1, %2, %cst {dimension_numbers = #tpu.dot_dimension_numbers<[1], [0], [0], [1], [0, 0, 1, 1], [], []>} : vector<64x16xbf16>, vector<16x128xbf16>, vector<64x128xf32> -> vector<64x128xf32>
    %c0_3 = arith.constant 0 : index
    %c0_4 = arith.constant 0 : index
    %4 = vector.load %arg3[%c0_3, %c0_4] : memref<1x128xf32, #tpu.memory_space<vmem>>, vector<1x128xf32>
    %5 = vector.broadcast %4 : vector<1x128xf32> to vector<64x128xf32>
    %6 = arith.addf %3, %5 : vector<64x128xf32>
    %c0_5 = arith.constant 0 : index
    %c0_6 = arith.constant 0 : index
    %7 = vector.load %arg2[%c0_5, %c0_6] : memref<128x128xbf16, #tpu.memory_space<vmem>>, vector<128x128xbf16>
    %cst_7 = arith.constant 0.000000e+00 : bf16
    %8 = vector.broadcast %cst_7 : bf16 to vector<8x128xbf16>
    %9 = vector.extract_strided_slice %6 {offsets = [0, 0], sizes = [8, 128], strides = [1, 1]} : vector<64x128xf32> to vector<8x128xf32>
    %cst_8 = arith.constant dense<0.000000e+00> : vector<8x128xf32>
    %10 = tpu.matmul %8, %7, %cst_8 {dimension_numbers = #tpu.dot_dimension_numbers<[1], [0], [0], [1], [0, 0, 1, 1], [], []>} : vector<8x128xbf16>, vector<128x128xbf16>, vector<8x128xf32> -> vector<8x128xf32>
    %11 = arith.addf %9, %10 : vector<8x128xf32>
    %12 = arith.truncf %11 : vector<8x128xf32> to vector<8x128xbf16>
    %13 = math.tanh %12 : vector<8x128xbf16>
    %14 = arith.extf %13 : vector<8x128xbf16> to vector<8x128xf32>
    %c0_9 = arith.constant 0 : index
    %c0_10 = arith.constant 0 : index
    %c0_11 = arith.constant 0 : index
    %15 = vector.load %arg6[%c0_9, %c0_10, %c0_11] : memref<8x8x128xf32, #tpu.memory_space<vmem>>, vector<1x8x128xf32>
    %16 = vector.shape_cast %15 : vector<1x8x128xf32> to vector<8x128xf32>
    %17 = vector.shape_cast %14 : vector<8x128xf32> to vector<1x8x128xf32>
    tpu.vector_store %arg6[%c0_9, %c0_10, %c0_11], %17 {strides = array<i32>} : memref<8x8x128xf32, #tpu.memory_space<vmem>>, vector<1x8x128xf32>,
    %18 = vector.extract_strided_slice %6 {offsets = [8, 0], sizes = [8, 128], strides = [1, 1]} : vector<64x128xf32> to vector<8x128xf32>
    %cst_12 = arith.constant dense<0.000000e+00> : vector<8x128xf32>
    %19 = tpu.matmul %13, %7, %cst_12 {dimension_numbers = #tpu.dot_dimension_numbers<[1], [0], [0], [1], [0, 0, 1, 1], [], []>} : vector<8x128xbf16>, vector<128x128xbf16>, vector<8x128xf32> -> vector<8x128xf32>
    %20 = arith.addf %18, %19 : vector<8x128xf32>
    %21 = arith.truncf %20 : vector<8x128xf32> to vector<8x128xbf16>
    %22 = math.tanh %21 : vector<8x128xbf16>
    %23 = arith.extf %22 : vector<8x128xbf16> to vector<8x128xf32>
    %c1 = arith.constant 1 : index
    %c0_13 = arith.constant 0 : index
    %c0_14 = arith.constant 0 : index
    %24 = vector.load %arg6[%c1, %c0_13, %c0_14] : memref<8x8x128xf32, #tpu.memory_space<vmem>>, vector<1x8x128xf32>
    %25 = vector.shape_cast %24 : vector<1x8x128xf32> to vector<8x128xf32>
    %26 = vector.shape_cast %23 : vector<8x128xf32> to vector<1x8x128xf32>
    tpu.vector_store %arg6[%c1, %c0_13, %c0_14], %26 {strides = array<i32>} : memref<8x8x128xf32, #tpu.memory_space<vmem>>, vector<1x8x128xf32>,
    %27 = vector.extract_strided_slice %6 {offsets = [16, 0], sizes = [8, 128], strides = [1, 1]} : vector<64x128xf32> to vector<8x128xf32>
    %cst_15 = arith.constant dense<0.000000e+00> : vector<8x128xf32>
    %28 = tpu.matmul %22, %7, %cst_15 {dimension_numbers = #tpu.dot_dimension_numbers<[1], [0], [0], [1], [0, 0, 1, 1], [], []>} : vector<8x128xbf16>, vector<128x128xbf16>, vector<8x128xf32> -> vector<8x128xf32>
    %29 = arith.addf %27, %28 : vector<8x128xf32>
    %30 = arith.truncf %29 : vector<8x128xf32> to vector<8x128xbf16>
    %31 = math.tanh %30 : vector<8x128xbf16>
    %32 = arith.extf %31 : vector<8x128xbf16> to vector<8x128xf32>
    %c2 = arith.constant 2 : index
    %c0_16 = arith.constant 0 : index
    %c0_17 = arith.constant 0 : index
    %33 = vector.load %arg6[%c2, %c0_16, %c0_17] : memref<8x8x128xf32, #tpu.memory_space<vmem>>, vector<1x8x128xf32>
    %34 = vector.shape_cast %33 : vector<1x8x128xf32> to vector<8x128xf32>
    %35 = vector.shape_cast %32 : vector<8x128xf32> to vector<1x8x128xf32>
    tpu.vector_store %arg6[%c2, %c0_16, %c0_17], %35 {strides = array<i32>} : memref<8x8x128xf32, #tpu.memory_space<vmem>>, vector<1x8x128xf32>,
    %36 = vector.extract_strided_slice %6 {offsets = [24, 0], sizes = [8, 128], strides = [1, 1]} : vector<64x128xf32> to vector<8x128xf32>
    %cst_18 = arith.constant dense<0.000000e+00> : vector<8x128xf32>
    %37 = tpu.matmul %31, %7, %cst_18 {dimension_numbers = #tpu.dot_dimension_numbers<[1], [0], [0], [1], [0, 0, 1, 1], [], []>} : vector<8x128xbf16>, vector<128x128xbf16>, vector<8x128xf32> -> vector<8x128xf32>
    %38 = arith.addf %36, %37 : vector<8x128xf32>
    %39 = arith.truncf %38 : vector<8x128xf32> to vector<8x128xbf16>
    %40 = math.tanh %39 : vector<8x128xbf16>
    %41 = arith.extf %40 : vector<8x128xbf16> to vector<8x128xf32>
    %c3 = arith.constant 3 : index
    %c0_19 = arith.constant 0 : index
    %c0_20 = arith.constant 0 : index
    %42 = vector.load %arg6[%c3, %c0_19, %c0_20] : memref<8x8x128xf32, #tpu.memory_space<vmem>>, vector<1x8x128xf32>
    %43 = vector.shape_cast %42 : vector<1x8x128xf32> to vector<8x128xf32>
    %44 = vector.shape_cast %41 : vector<8x128xf32> to vector<1x8x128xf32>
    tpu.vector_store %arg6[%c3, %c0_19, %c0_20], %44 {strides = array<i32>} : memref<8x8x128xf32, #tpu.memory_space<vmem>>, vector<1x8x128xf32>,
    %45 = vector.extract_strided_slice %6 {offsets = [32, 0], sizes = [8, 128], strides = [1, 1]} : vector<64x128xf32> to vector<8x128xf32>
    %cst_21 = arith.constant dense<0.000000e+00> : vector<8x128xf32>
    %46 = tpu.matmul %40, %7, %cst_21 {dimension_numbers = #tpu.dot_dimension_numbers<[1], [0], [0], [1], [0, 0, 1, 1], [], []>} : vector<8x128xbf16>, vector<128x128xbf16>, vector<8x128xf32> -> vector<8x128xf32>
    %47 = arith.addf %45, %46 : vector<8x128xf32>
    %48 = arith.truncf %47 : vector<8x128xf32> to vector<8x128xbf16>
    %49 = math.tanh %48 : vector<8x128xbf16>
    %50 = arith.extf %49 : vector<8x128xbf16> to vector<8x128xf32>
    %c4 = arith.constant 4 : index
    %c0_22 = arith.constant 0 : index
    %c0_23 = arith.constant 0 : index
    %51 = vector.load %arg6[%c4, %c0_22, %c0_23] : memref<8x8x128xf32, #tpu.memory_space<vmem>>, vector<1x8x128xf32>
    %52 = vector.shape_cast %51 : vector<1x8x128xf32> to vector<8x128xf32>
    %53 = vector.shape_cast %50 : vector<8x128xf32> to vector<1x8x128xf32>
    tpu.vector_store %arg6[%c4, %c0_22, %c0_23], %53 {strides = array<i32>} : memref<8x8x128xf32, #tpu.memory_space<vmem>>, vector<1x8x128xf32>,
    %54 = vector.extract_strided_slice %6 {offsets = [40, 0], sizes = [8, 128], strides = [1, 1]} : vector<64x128xf32> to vector<8x128xf32>
    %cst_24 = arith.constant dense<0.000000e+00> : vector<8x128xf32>
    %55 = tpu.matmul %49, %7, %cst_24 {dimension_numbers = #tpu.dot_dimension_numbers<[1], [0], [0], [1], [0, 0, 1, 1], [], []>} : vector<8x128xbf16>, vector<128x128xbf16>, vector<8x128xf32> -> vector<8x128xf32>
    %56 = arith.addf %54, %55 : vector<8x128xf32>
    %57 = arith.truncf %56 : vector<8x128xf32> to vector<8x128xbf16>
    %58 = math.tanh %57 : vector<8x128xbf16>
    %59 = arith.extf %58 : vector<8x128xbf16> to vector<8x128xf32>
    %c5 = arith.constant 5 : index
    %c0_25 = arith.constant 0 : index
    %c0_26 = arith.constant 0 : index
    %60 = vector.load %arg6[%c5, %c0_25, %c0_26] : memref<8x8x128xf32, #tpu.memory_space<vmem>>, vector<1x8x128xf32>
    %61 = vector.shape_cast %60 : vector<1x8x128xf32> to vector<8x128xf32>
    %62 = vector.shape_cast %59 : vector<8x128xf32> to vector<1x8x128xf32>
    tpu.vector_store %arg6[%c5, %c0_25, %c0_26], %62 {strides = array<i32>} : memref<8x8x128xf32, #tpu.memory_space<vmem>>, vector<1x8x128xf32>,
    %63 = vector.extract_strided_slice %6 {offsets = [48, 0], sizes = [8, 128], strides = [1, 1]} : vector<64x128xf32> to vector<8x128xf32>
    %cst_27 = arith.constant dense<0.000000e+00> : vector<8x128xf32>
    %64 = tpu.matmul %58, %7, %cst_27 {dimension_numbers = #tpu.dot_dimension_numbers<[1], [0], [0], [1], [0, 0, 1, 1], [], []>} : vector<8x128xbf16>, vector<128x128xbf16>, vector<8x128xf32> -> vector<8x128xf32>
    %65 = arith.addf %63, %64 : vector<8x128xf32>
    %66 = arith.truncf %65 : vector<8x128xf32> to vector<8x128xbf16>
    %67 = math.tanh %66 : vector<8x128xbf16>
    %68 = arith.extf %67 : vector<8x128xbf16> to vector<8x128xf32>
    %c6 = arith.constant 6 : index
    %c0_28 = arith.constant 0 : index
    %c0_29 = arith.constant 0 : index
    %69 = vector.load %arg6[%c6, %c0_28, %c0_29] : memref<8x8x128xf32, #tpu.memory_space<vmem>>, vector<1x8x128xf32>
    %70 = vector.shape_cast %69 : vector<1x8x128xf32> to vector<8x128xf32>
    %71 = vector.shape_cast %68 : vector<8x128xf32> to vector<1x8x128xf32>
    tpu.vector_store %arg6[%c6, %c0_28, %c0_29], %71 {strides = array<i32>} : memref<8x8x128xf32, #tpu.memory_space<vmem>>, vector<1x8x128xf32>,
    %72 = vector.extract_strided_slice %6 {offsets = [56, 0], sizes = [8, 128], strides = [1, 1]} : vector<64x128xf32> to vector<8x128xf32>
    %cst_30 = arith.constant dense<0.000000e+00> : vector<8x128xf32>
    %73 = tpu.matmul %67, %7, %cst_30 {dimension_numbers = #tpu.dot_dimension_numbers<[1], [0], [0], [1], [0, 0, 1, 1], [], []>} : vector<8x128xbf16>, vector<128x128xbf16>, vector<8x128xf32> -> vector<8x128xf32>
    %74 = arith.addf %72, %73 : vector<8x128xf32>
    %75 = arith.truncf %74 : vector<8x128xf32> to vector<8x128xbf16>
    %76 = math.tanh %75 : vector<8x128xbf16>
    %77 = arith.extf %76 : vector<8x128xbf16> to vector<8x128xf32>
    %c7 = arith.constant 7 : index
    %c0_31 = arith.constant 0 : index
    %c0_32 = arith.constant 0 : index
    %78 = vector.load %arg6[%c7, %c0_31, %c0_32] : memref<8x8x128xf32, #tpu.memory_space<vmem>>, vector<1x8x128xf32>
    %79 = vector.shape_cast %78 : vector<1x8x128xf32> to vector<8x128xf32>
    %80 = vector.shape_cast %77 : vector<8x128xf32> to vector<1x8x128xf32>
    tpu.vector_store %arg6[%c7, %c0_31, %c0_32], %80 {strides = array<i32>} : memref<8x8x128xf32, #tpu.memory_space<vmem>>, vector<1x8x128xf32>,
    %c0_33 = arith.constant 0 : index
    %c0_34 = arith.constant 0 : index
    %81 = vector.load %arg4[%c0_33, %c0_34] : memref<128x128xbf16, #tpu.memory_space<vmem>>, vector<128x128xbf16>
    %cst_35 = arith.constant dense<0.000000e+00> : vector<8x128xf32>
    %82 = tpu.matmul %76, %81, %cst_35 {dimension_numbers = #tpu.dot_dimension_numbers<[1], [0], [0], [1], [0, 0, 1, 1], [], []>} : vector<8x128xbf16>, vector<128x128xbf16>, vector<8x128xf32> -> vector<8x128xf32>
    %c0_36 = arith.constant 0 : index
    %c0_37 = arith.constant 0 : index
    %83 = vector.load %arg5[%c0_36, %c0_37] : memref<1x128xf32, #tpu.memory_space<vmem>>, vector<1x128xf32>
    %84 = vector.broadcast %83 : vector<1x128xf32> to vector<8x128xf32>
    %85 = arith.addf %82, %84 : vector<8x128xf32>
    %86 = math.tanh %85 : vector<8x128xf32>
    %c0_38 = arith.constant 0 : index
    %c0_39 = arith.constant 0 : index
    %87 = vector.load %arg7[%c0_38, %c0_39] : memref<8x128xf32, #tpu.memory_space<vmem>>, vector<8x128xf32>
    tpu.vector_store %arg7[%c0_38, %c0_39], %86 {strides = array<i32>} : memref<8x128xf32, #tpu.memory_space<vmem>>, vector<8x128xf32>,
    return
  }
}

</mosaic_0001>

<bundles_post_ra>
// kernel: rnn_forward_decode.1
= control target key start
LH: loop header
LB: loop body
LE: loop exit
PB: predicated region body
PF: predicated region fallthrough
CT: control target
= control target key end

     0   :  { %13 = vsyncpa [#allocation3], 0  ;;  %s1609_s0 = inlined_call_operand.hbm [shape: f32[64,16], index: 0, kind: input, shape index: {}]   ;;  %s1610_s1 = inlined_call_operand.hbm [shape: bf16[16,128], index: 1, kind: input, shape index: {}]   ;;  %s1611_s2 = inlined_call_operand.hbm [shape: bf16[128,128], index: 2, kind: input, shape index: {}]   ;;  %s1612_s3 = inlined_call_operand.vmem [shape: f32[1,128], index: 3, kind: input, shape index: {}]   ;;  %s1613_s4 = inlined_call_operand.hbm [shape: bf16[128,128], index: 4, kind: input, shape index: {}]   ;;  %s1614_s5 = inlined_call_operand.vmem [shape: f32[1,128], index: 5, kind: input, shape index: {}]   ;;  %s1615_s6 = inlined_call_operand.hbm [shape: f32[8,8,128], index: 6, kind: output, shape index: {0}]   ;;  %s1616_s7 = inlined_call_operand.hbm [shape: f32[8,128], index: 7, kind: output, shape index: {1}]  }
   0x1   :  { %14 = vsyncpa [#allocation6], 0 }
   0x2   :  { %15 = vsyncpa [#allocation9], 0 }
   0x3   :  { %16 = vsyncpa [#allocation4], 0 }
   0x4   :  { %17 = vsyncpa [#allocation12], 0  ;;  %s1254_s24 = smov [#allocation5]   ;;  %s1112_s28 = scalar_lea.hbm %s1610_s1, 128 }
   0x5   :  { %s35_s25 = sshll.u32 %s1254_s24, 4  ;;  %p1113_p0 = scmp.ne.s32.totalorder %s1610_s1, %s1112_s28  ;;  %s36_s25 = int_to_ptr.vmem [resolvable:$true] %s35_s25 }
   0x6   :  { %p1116_p1 = scmp.lt.u32.totalorder %s1112_s28, %s1610_s1 }
   0x8   :  { %p1118_p2 = pnand %p1116_p1, %p1113_p0 }
   0xa   :  { %1121 = shalt.err (!%p1118_p2)
}
   0xb   :  { %s1122_s10 = scalar_lea.vmem %s36_s25, 128  ;;  %p1127_p4 = scmp.lt.s32.totalorder %s36_s25, %s36_s25 }
   0xc   :  { %p1123_p3 = scmp.ne.s32.totalorder %s36_s25, %s1122_s10  ;;  %p1128_p5 = scmp.lt.s32.totalorder %s1122_s10, %s1122_s10 }
   0xe   :  { %p1129_p6 = por %p1128_p5, %p1127_p4 }
  0x10   :  { %p1130_p7 = pnand %p1129_p6, %p1123_p3 }
  0x12   :  { %1133 = shalt.err (!%p1130_p7)
}
  0x13   :  { %s1255_s11 = smov 64   ;;  %s1256_s12 = smov 4  }
  0x14   :  { %41 = dma.hbm_to_vmem [thread:$0]  %s1610_s1, 128, %s36_s25, [#allocation6], %s1255_s11, %s1255_s11, %s1256_s12  }
  0x15   :  { %s1257_s15 = smov [#allocation2]   ;;  %s1134_s19 = scalar_lea.hbm %s1609_s0, 1024 }
  0x16   :  { %s23_s16 = sshll.u32 %s1257_s15, 4  ;;  %p1135_p8 = scmp.ne.s32.totalorder %s1609_s0, %s1134_s19  ;;  %s24_s16 = int_to_ptr.vmem [resolvable:$true] %s23_s16 }
  0x17   :  { %p1138_p9 = scmp.lt.u32.totalorder %s1134_s19, %s1609_s0 }
  0x19   :  { %p1140_p10 = pnand %p1138_p9, %p1135_p8 }
  0x1b   :  { %1143 = shalt.err (!%p1140_p10)
}
  0x1c   :  { %s1144_s24 = scalar_lea.vmem %s24_s16, 1024  ;;  %p1149_p12 = scmp.lt.s32.totalorder %s24_s16, %s24_s16 }
  0x1d   :  { %p1145_p11 = scmp.ne.s32.totalorder %s24_s16, %s1144_s24  ;;  %p1150_p13 = scmp.lt.s32.totalorder %s1144_s24, %s1144_s24 }
  0x1f   :  { %p1151_p0 = por %p1150_p13, %p1149_p12 }
  0x21   :  { %p1152_p1 = pnand %p1151_p0, %p1145_p11 }
  0x23   :  { %1155 = shalt.err (!%p1152_p1)
}
  0x24   :  { %s1258_s1 = smov 128   ;;  %s1259_s25 = smov 8  }
  0x25   :  { %29 = dma.hbm_to_vmem [thread:$0]  %s1609_s0, 1024, %s24_s16, [#allocation3], %s1258_s1, %s1258_s1, %s1259_s25  }
  0x26   :  { %s1260_s28 = smov [#allocation7]   ;;  %s1261_s30 = smov [#allocation8]  }
  0x27   :  { %s47_s29 = sshll.u32 %s1260_s28, 4  ;;  %s61_s8 = sshll.u32 %s1261_s30, 4  ;;  %s48_s29 = int_to_ptr.vmem [resolvable:$true] %s47_s29  ;;  %s1337_s8 = int_to_ptr.vmem [resolvable:$true] %s61_s8 }
  0x28   :  { %s1156_s13 = scalar_lea.hbm %s1611_s2, 1024 }
  0x29   :  { %p1157_p2 = scmp.ne.s32.totalorder %s1611_s2, %s1156_s13  ;;  %p1160_p3 = scmp.lt.u32.totalorder %s1156_s13, %s1611_s2 }
  0x2b   :  { %p1162_p4 = pnand %p1160_p3, %p1157_p2 }
  0x2d   :  { %1165 = shalt.err (!%p1162_p4)
}
  0x2e   :  { %s1166_s0 = scalar_lea.vmem %s48_s29, 1024  ;;  %p1171_p6 = scmp.lt.s32.totalorder %s48_s29, %s48_s29 }
  0x2f   :  { %p1167_p5 = scmp.ne.s32.totalorder %s48_s29, %s1166_s0  ;;  %p1172_p7 = scmp.lt.s32.totalorder %s1166_s0, %s1166_s0 }
  0x31   :  { %p1173_p8 = por %p1172_p7, %p1171_p6 }
  0x33   :  { %p1174_p9 = pnand %p1173_p8, %p1167_p5 }
  0x35   :  { %1177 = shalt.err (!%p1174_p9)
}
  0x36   :  { %53 = dma.hbm_to_vmem [thread:$0]  %s1611_s2, 1024, %s48_s29, [#allocation6], %s1255_s11, %s1255_s11, %s1256_s12  }
  0x37   :  { %s1178_s22 = scalar_lea.hbm %s1613_s4, 1024 }
  0x38   :  { %p1179_p10 = scmp.ne.s32.totalorder %s1613_s4, %s1178_s22  ;;  %p1182_p11 = scmp.lt.u32.totalorder %s1178_s22, %s1613_s4 }
  0x3a   :  { %p1184_p12 = pnand %p1182_p11, %p1179_p10 }
  0x3c   :  { %1187 = shalt.err (!%p1184_p12)
}
  0x3d   :  { %s1188_s28 = scalar_lea.vmem %s1337_s8, 1024  ;;  %p1193_p0 = scmp.lt.s32.totalorder %s1337_s8, %s1337_s8 }
  0x3e   :  { %p1189_p13 = scmp.ne.s32.totalorder %s1337_s8, %s1188_s28  ;;  %p1194_p1 = scmp.lt.s32.totalorder %s1188_s28, %s1188_s28 }
  0x40   :  { %p1195_p2 = por %p1194_p1, %p1193_p0 }
  0x42   :  { %p1196_p3 = pnand %p1195_p2, %p1189_p13 }
  0x44   :  { %1199 = shalt.err (!%p1196_p3)
}
  0x45   :  { %67 = dma.hbm_to_vmem [thread:$0]  %s1613_s4, 1024, %s1337_s8, [#allocation9], %s1255_s11, %s1255_s11, %s1256_s12  }
  0x46   :  { %1244 = dma.done.wait [#allocation3], 1024  }
  0x47   :  { %1245 = vsyncadd [#allocation3], 4294966272 }
  0x48   :  { %1246 = dma.done.wait [#allocation6], 1152  }
  0x49   :  { %1247 = vsyncadd [#allocation6], 4294966144 }
  0x4a   :  { %1248 = dma.done.wait [#allocation9], 1024  }
  0x4b   :  { %1249 = vsyncadd [#allocation9], 4294966272  ;;  %v1262_v0 = vmov 0.0   ;;  %vm1263_vm0 = vmmov 0   ;;  %v1377_v1 = vld [vmem:[#allocation7] sm:$0xff]   ;;  %v1380_v2 = vld [vmem:[#allocation7 + $0x8] sm:$0xff]  }
  0x4c   :  { %884 = vmatprep.subr.bf16.mxu1 %v1262_v0  ;;  %900 = vmatprep.mubr.msk.bf16.mxu1 %vm1263_vm0, %v1262_v0  ;;  %v1383_v3 = vld [vmem:[#allocation7 + $0x10] sm:$0xff]   ;;  %v1083_v4 = vld [vmem:[#allocation5] sm:$0xff]   ;;  %v84_v6 = vld [vmem:[#allocation2 + $0x8] sm:$0xff]  ;;  %vm110_vm1 = vcmask 130048   ;;  %v1264_v16 = vmov 0  }
  0x4d   :  { %885 = vmatpush3.bf16.msra.mxu1 %v1377_v1  ;;  %v83_v5 = vld [vmem:[#allocation2] sm:$0xff]  ;;  %874 = vmatprep.subr.bf16.mxu0 %v1083_v4  ;;  %v85_v8 = vld [vmem:[#allocation2 + $0x10] sm:$0xff]  ;;  %v86_v9 = vld [vmem:[#allocation2 + $0x18] sm:$0xff] }
  0x4e   :  { %886 = vmatprep.subr.bf16.mxu1 %v1262_v0  ;;  %v91_v7 = vpack.c.bf16 %v84_v6, %v83_v5  ;;  %875 = vmatpush3.bf16.msra.mxu0 %v1083_v4  ;;  %v1388_v10 = vld [vmem:[#allocation7 + $0x18] sm:$0xff]   ;;  %v92_v11 = vpack.c.bf16 %v86_v9, %v85_v8  ;;  %v1393_v12 = vld [vmem:[#allocation7 + $0x20] sm:$0xff]   ;;  %v1402_v13 = vld [vmem:[#allocation7 + $0x28] sm:$0xff]  }
  0x4f   :  { %904 = vmatprep.subr.bf16.mxu0 %v1262_v0  ;;  %v1408_v14 = vld [vmem:[#allocation7 + $0x30] sm:$0xff]   ;;  %v1414_v15 = vld [vmem:[#allocation7 + $0x38] sm:$0xff]   ;;  %v88_v18 = vld [vmem:[#allocation2 + $0x28] sm:$0xff] }
  0x50   :  { %876 = vmatprep.mubr.msk.bf16.mxu0 %vm110_vm1, %v91_v7  ;;  %v87_v17 = vld [vmem:[#allocation2 + $0x20] sm:$0xff]  ;;  %v89_v20 = vld [vmem:[#allocation2 + $0x30] sm:$0xff]  ;;  %v90_v21 = vld [vmem:[#allocation2 + $0x38] sm:$0xff] }
  0x51   :  { %887 = vmatpush3.bf16.msra.mxu1 %v1380_v2  ;;  %877 = vmatmul.mubr.msk.bf16.vlgmr.msra.gmra.mrb[0].mxu0 %vm110_vm1, %v92_v11  ;;  %v93_v19 = vpack.c.bf16 %v88_v18, %v87_v17  ;;  %v94_v22 = vpack.c.bf16 %v90_v21, %v89_v20  ;;  %v1457_v27 = vld [vmem:[%s1612_s3] ss:$0 sm:$0xff]  ;;  %s1265_s3 = smov [#allocation10]  }
  0x52   :  { %888 = vmatprep.subr.bf16.mxu1 %v1262_v0  ;;  %905 = vmatpush3.bf16.msra.mxu0 %v1377_v1  ;;  %s737_s12 = sshll.u32 %s1265_s3, 4  ;;  %s738_s12 = int_to_ptr.vmem [resolvable:$true] %s737_s12 }
  0x53   :  { %906 = vmatprep.subr.bf16.mxu0 %v1262_v0  ;;  %880 = vmatprep.mubr.msk.bf16.mxu0 %vm110_vm1, %v93_v19  ;;  %s1200_s30 = scalar_lea.vmem %s738_s12, 1024  ;;  %p1205_p5 = scmp.lt.s32.totalorder %s738_s12, %s738_s12 }
  0x54   :  { %p1201_p4 = scmp.ne.s32.totalorder %s738_s12, %s1200_s30  ;;  %p1206_p6 = scmp.lt.s32.totalorder %s1200_s30, %s1200_s30 }
  0x55   :  { %889 = vmatpush3.bf16.msra.mxu1 %v1383_v3 }
  0x56   :  { %890 = vmatprep.subr.bf16.mxu1 %v1262_v0  ;;  %907 = vmatpush3.bf16.msra.mxu0 %v1380_v2  ;;  %p1207_p7 = por %p1206_p6, %p1205_p5 }
  0x57   :  { %908 = vmatprep.subr.bf16.mxu0 %v1262_v0 }
  0x58   :  { %p1208_p8 = pnand %p1207_p7, %p1201_p4 }
  0x59   :  { %891 = vmatpush3.bf16.msra.mxu1 %v1388_v10  ;;  %881 = vmatmul.mubr.msk.bf16.gmra.mrb[4].mxu0 %vm110_vm1, %v94_v22 }
  0x5a   :  { %892 = vmatprep.subr.bf16.mxu1 %v1262_v0  ;;  %909 = vmatpush3.bf16.msra.mxu0 %v1383_v3 }
  0x5b   :  { %910 = vmatprep.subr.bf16.mxu0 %v1262_v0  ;;  %920 = vmatprep.mubr.msk.bf16.mxu0 %vm1263_vm0, %v1262_v0 }
  0x5d   :  { %893 = vmatpush3.bf16.msra.mxu1 %v1393_v12 }
  0x5e   :  { %894 = vmatprep.subr.bf16.mxu1 %v1262_v0  ;;  %911 = vmatpush3.bf16.msra.mxu0 %v1388_v10 }
  0x5f   :  { %912 = vmatprep.subr.bf16.mxu0 %v1262_v0 }
  0x61   :  { %895 = vmatpush3.bf16.msra.mxu1 %v1402_v13 }
  0x62   :  { %896 = vmatprep.subr.bf16.mxu1 %v1262_v0  ;;  %913 = vmatpush3.bf16.msra.mxu0 %v1393_v12 }
  0x63   :  { %914 = vmatprep.subr.bf16.mxu0 %v1262_v0 }
  0x65   :  { %897 = vmatpush3.bf16.msra.mxu1 %v1408_v14 }
  0x66   :  { %898 = vmatprep.subr.bf16.mxu1 %v1262_v0  ;;  %915 = vmatpush3.bf16.msra.mxu0 %v1402_v13 }
  0x67   :  { %916 = vmatprep.subr.bf16.mxu0 %v1262_v0 }
  0x69   :  { %899 = vmatpush3.bf16.msra.mxu1 %v1414_v15 }
  0x6a   :  { %924 = vmatprep.subr.bf16.mxu1 %v1262_v0  ;;  %917 = vmatpush3.bf16.msra.mxu0 %v1408_v14 }
  0x6b   :  { %918 = vmatprep.subr.bf16.mxu0 %v1262_v0 }
  0x6c   :  { %901 = vmatmul.mubr.bf16.vlgmr.msra.gmra.mrb[0].mxu1 %v1264_v16 }
  0x6d   :  { %925 = vmatpush3.bf16.msra.mxu1 %v1377_v1  ;;  %940 = vmatprep.mubr.msk.bf16.mxu1 %vm1263_vm0, %v1262_v0 }
  0x6e   :  { %926 = vmatprep.subr.bf16.mxu1 %v1262_v0  ;;  %919 = vmatpush3.bf16.msra.mxu0 %v1414_v15 }
  0x6f   :  { %944 = vmatprep.subr.bf16.mxu0 %v1262_v0 }
  0x71   :  { %927 = vmatpush3.bf16.msra.mxu1 %v1380_v2 }
  0x72   :  { %928 = vmatprep.subr.bf16.mxu1 %v1262_v0 }
  0x75   :  { %929 = vmatpush3.bf16.msra.mxu1 %v1383_v3 }
  0x76   :  { %930 = vmatprep.subr.bf16.mxu1 %v1262_v0 }
  0x79   :  { %931 = vmatpush3.bf16.msra.mxu1 %v1388_v10 }
  0x7a   :  { %932 = vmatprep.subr.bf16.mxu1 %v1262_v0 }
  0x7d   :  { %933 = vmatpush3.bf16.msra.mxu1 %v1393_v12 }
  0x7e   :  { %934 = vmatprep.subr.bf16.mxu1 %v1262_v0 }
  0x81   :  { %935 = vmatpush3.bf16.msra.mxu1 %v1402_v13 }
  0x82   :  { %936 = vmatprep.subr.bf16.mxu1 %v1262_v0 }
  0x85   :  { %937 = vmatpush3.bf16.msra.mxu1 %v1408_v14 }
  0x86   :  { %938 = vmatprep.subr.bf16.mxu1 %v1262_v0 }
  0x89   :  { %939 = vmatpush3.bf16.msra.mxu1 %v1414_v15 }
  0x8a   :  { %964 = vmatprep.subr.bf16.mxu1 %v1262_v0 }
 0x124   :  { %v1450_v23 = vpop.f32.mrb[0].mxu0 }
 0x125   :  { %v157_v24 = vpop.f32.mrb[1].mxu0  ;;  %v166_v50 = vadd.f32 %v1450_v23, %v1457_v27 }
 0x126   :  { %v1452_v25 = vpop.f32.mrb[2].mxu0  ;;  %v158_v28 = vadd.f32 %v1457_v27, %v157_v24 }
 0x127   :  { %v160_v26 = vpop.f32.mrb[3].mxu0  ;;  %v169_v59 = vadd.f32 %v1452_v25, %v1457_v27  ;;  %v1088_v25 = vld [vmem:[#allocation8 + $0x10] sm:$0xff]  }
 0x128   :  { %v161_v41 = vadd.f32 %v1457_v27, %v160_v26  ;;  %v1089_v26 = vld [vmem:[#allocation8 + $0x18] sm:$0xff]  }
 0x12c   :  { %v1478_v37 = vpop.f32.mrb[4].mxu0 }
 0x12d   :  { %v1480_v38 = vpop.f32.mrb[5].mxu0 }
 0x12e   :  { %v1482_v39 = vpop.f32.mrb[6].mxu0  ;;  %v174_v8 = vadd.f32 %v1457_v27, %v1480_v38  ;;  %v1090_v38 = vld [vmem:[#allocation8 + $0x20] sm:$0xff]  }
 0x12f   :  { %v1484_v40 = vpop.f32.mrb[7].mxu0 }
 0x13f   :  { %v286_v29 = vpop.f32.mrb[0].mxu1 }
 0x140   :  { %v292_v30 = vadd.f32 %v286_v29, %v158_v28  ;;  %v902_v31 = vpop.f32.mrb[1].mxu1  ;;  %v182_v28 = vadd.f32 %v1478_v37, %v1457_v27  ;;  %v1092_v37 = vld [vmem:[#allocation8 + $0x30] sm:$0xff]  }
 0x141   :  { %v289_v32 = vpop.f32.mrb[2].mxu1 }
 0x142   :  { %v293_v33 = vpack.c.bf16 %v292_v30, %v292_v30  ;;  %v903_v34 = vpop.f32.mrb[3].mxu1 }
 0x144   :  { %1094 = vtanh.bf16 %v293_v33 }
 0x14f   :  { %v1095_v35 = vpop.eup %1094 }
 0x150   :  { %v295_v36 = vunpack.c.l.bf16 %v1095_v35  ;;  %921 = vmatmul.mubr.bf16.vlgmr.msra.gmra.mrb[8].mxu0 %v1095_v35 }
 0x151   :  { %945 = vmatpush3.bf16.msra.mxu0 %v1377_v1  ;;  %960 = vmatprep.mubr.msk.bf16.mxu0 %vm1263_vm0, %v1262_v0 }
 0x152   :  { %296 = vst [vmem:[#allocation10] sm:$0xff] %v295_v36  ;;  %946 = vmatprep.subr.bf16.mxu0 %v1262_v0 }
 0x155   :  { %947 = vmatpush3.bf16.msra.mxu0 %v1380_v2 }
 0x156   :  { %948 = vmatprep.subr.bf16.mxu0 %v1262_v0 }
 0x159   :  { %949 = vmatpush3.bf16.msra.mxu0 %v1383_v3 }
 0x15a   :  { %950 = vmatprep.subr.bf16.mxu0 %v1262_v0 }
 0x15d   :  { %951 = vmatpush3.bf16.msra.mxu0 %v1388_v10 }
 0x15e   :  { %952 = vmatprep.subr.bf16.mxu0 %v1262_v0 }
 0x161   :  { %953 = vmatpush3.bf16.msra.mxu0 %v1393_v12 }
 0x162   :  { %954 = vmatprep.subr.bf16.mxu0 %v1262_v0 }
 0x165   :  { %955 = vmatpush3.bf16.msra.mxu0 %v1402_v13 }
 0x166   :  { %956 = vmatprep.subr.bf16.mxu0 %v1262_v0 }
 0x169   :  { %957 = vmatpush3.bf16.msra.mxu0 %v1408_v14 }
 0x16a   :  { %958 = vmatprep.subr.bf16.mxu0 %v1262_v0 }
 0x16d   :  { %959 = vmatpush3.bf16.msra.mxu0 %v1414_v15 }
 0x16e   :  { %984 = vmatprep.subr.bf16.mxu0 %v1262_v0 }
 0x223   :  { %v331_v42 = vpop.f32.mrb[8].mxu0 }
 0x224   :  { %v337_v43 = vadd.f32 %v331_v42, %v161_v41  ;;  %v922_v44 = vpop.f32.mrb[9].mxu0  ;;  %v1093_v41 = vld [vmem:[#allocation8 + $0x38] sm:$0xff]   ;;  %v185_v42 = vadd.f32 %v1482_v39, %v1457_v27 }
 0x225   :  { %v334_v45 = vpop.f32.mrb[10].mxu0 }
 0x226   :  { %v338_v46 = vpack.c.bf16 %v337_v43, %v337_v43  ;;  %v923_v47 = vpop.f32.mrb[11].mxu0 }
 0x228   :  { %1096 = vtanh.bf16 %v338_v46 }
 0x233   :  { %v1097_v48 = vpop.eup %1096 }
 0x234   :  { %v340_v49 = vunpack.c.l.bf16 %v1097_v48  ;;  %941 = vmatmul.mubr.bf16.vlgmr.msra.gmra.mrb[4].mxu1 %v1097_v48 }
 0x235   :  { %965 = vmatpush3.bf16.msra.mxu1 %v1377_v1  ;;  %980 = vmatprep.mubr.msk.bf16.mxu1 %vm1263_vm0, %v1262_v0 }
 0x236   :  { %342 = vst [vmem:[#allocation10 + $0x8] sm:$0xff] %v340_v49  ;;  %966 = vmatprep.subr.bf16.mxu1 %v1262_v0 }
 0x239   :  { %967 = vmatpush3.bf16.msra.mxu1 %v1380_v2 }
 0x23a   :  { %968 = vmatprep.subr.bf16.mxu1 %v1262_v0 }
 0x23d   :  { %969 = vmatpush3.bf16.msra.mxu1 %v1383_v3 }
 0x23e   :  { %970 = vmatprep.subr.bf16.mxu1 %v1262_v0 }
 0x241   :  { %971 = vmatpush3.bf16.msra.mxu1 %v1388_v10 }
 0x242   :  { %972 = vmatprep.subr.bf16.mxu1 %v1262_v0 }
 0x245   :  { %973 = vmatpush3.bf16.msra.mxu1 %v1393_v12 }
 0x246   :  { %974 = vmatprep.subr.bf16.mxu1 %v1262_v0 }
 0x249   :  { %975 = vmatpush3.bf16.msra.mxu1 %v1402_v13 }
 0x24a   :  { %976 = vmatprep.subr.bf16.mxu1 %v1262_v0 }
 0x24d   :  { %977 = vmatpush3.bf16.msra.mxu1 %v1408_v14 }
 0x24e   :  { %978 = vmatprep.subr.bf16.mxu1 %v1262_v0 }
 0x251   :  { %979 = vmatpush3.bf16.msra.mxu1 %v1414_v15 }
 0x252   :  { %1004 = vmatprep.subr.bf16.mxu1 %v1262_v0 }
 0x307   :  { %v377_v51 = vpop.f32.mrb[4].mxu1 }
 0x308   :  { %v383_v52 = vadd.f32 %v377_v51, %v166_v50  ;;  %v942_v53 = vpop.f32.mrb[5].mxu1 }
 0x309   :  { %v380_v54 = vpop.f32.mrb[6].mxu1 }
 0x30a   :  { %v384_v55 = vpack.c.bf16 %v383_v52, %v383_v52  ;;  %v943_v56 = vpop.f32.mrb[7].mxu1 }
 0x30c   :  { %1098 = vtanh.bf16 %v384_v55 }
 0x317   :  { %v1099_v57 = vpop.eup %1098 }
 0x318   :  { %v386_v58 = vunpack.c.l.bf16 %v1099_v57  ;;  %961 = vmatmul.mubr.bf16.vlgmr.msra.gmra.mrb[12].mxu0 %v1099_v57 }
 0x319   :  { %985 = vmatpush3.bf16.msra.mxu0 %v1377_v1  ;;  %1000 = vmatprep.mubr.msk.bf16.mxu0 %vm1263_vm0, %v1262_v0 }
 0x31a   :  { %388 = vst [vmem:[#allocation10 + $0x10] sm:$0xff] %v386_v58  ;;  %986 = vmatprep.subr.bf16.mxu0 %v1262_v0 }
 0x31d   :  { %987 = vmatpush3.bf16.msra.mxu0 %v1380_v2 }
 0x31e   :  { %988 = vmatprep.subr.bf16.mxu0 %v1262_v0 }
 0x321   :  { %989 = vmatpush3.bf16.msra.mxu0 %v1383_v3 }
 0x322   :  { %990 = vmatprep.subr.bf16.mxu0 %v1262_v0 }
 0x325   :  { %991 = vmatpush3.bf16.msra.mxu0 %v1388_v10 }
 0x326   :  { %992 = vmatprep.subr.bf16.mxu0 %v1262_v0 }
 0x329   :  { %993 = vmatpush3.bf16.msra.mxu0 %v1393_v12 }
 0x32a   :  { %994 = vmatprep.subr.bf16.mxu0 %v1262_v0 }
 0x32d   :  { %995 = vmatpush3.bf16.msra.mxu0 %v1402_v13 }
 0x32e   :  { %996 = vmatprep.subr.bf16.mxu0 %v1262_v0 }
 0x331   :  { %997 = vmatpush3.bf16.msra.mxu0 %v1408_v14 }
 0x332   :  { %998 = vmatprep.subr.bf16.mxu0 %v1262_v0 }
 0x335   :  { %999 = vmatpush3.bf16.msra.mxu0 %v1414_v15 }
 0x336   :  { %1024 = vmatprep.subr.bf16.mxu0 %v1262_v0 }
 0x3eb   :  { %v423_v60 = vpop.f32.mrb[12].mxu0 }
 0x3ec   :  { %v429_v61 = vadd.f32 %v423_v60, %v169_v59  ;;  %v962_v62 = vpop.f32.mrb[13].mxu0 }
 0x3ed   :  { %v426_v63 = vpop.f32.mrb[14].mxu0 }
 0x3ee   :  { %v430_v4 = vpack.c.bf16 %v429_v61, %v429_v61  ;;  %v963_v5 = vpop.f32.mrb[15].mxu0 }
 0x3f0   :  { %1100 = vtanh.bf16 %v430_v4 }
 0x3fb   :  { %v1101_v6 = vpop.eup %1100 }
 0x3fc   :  { %v432_v7 = vunpack.c.l.bf16 %v1101_v6  ;;  %981 = vmatmul.mubr.bf16.vlgmr.msra.gmra.mrb[8].mxu1 %v1101_v6 }
 0x3fd   :  { %1005 = vmatpush3.bf16.msra.mxu1 %v1377_v1  ;;  %1020 = vmatprep.mubr.msk.bf16.mxu1 %vm1263_vm0, %v1262_v0 }
 0x3fe   :  { %434 = vst [vmem:[#allocation10 + $0x18] sm:$0xff] %v432_v7  ;;  %1006 = vmatprep.subr.bf16.mxu1 %v1262_v0 }
 0x401   :  { %1007 = vmatpush3.bf16.msra.mxu1 %v1380_v2 }
 0x402   :  { %1008 = vmatprep.subr.bf16.mxu1 %v1262_v0 }
 0x405   :  { %1009 = vmatpush3.bf16.msra.mxu1 %v1383_v3 }
 0x406   :  { %1010 = vmatprep.subr.bf16.mxu1 %v1262_v0 }
 0x409   :  { %1011 = vmatpush3.bf16.msra.mxu1 %v1388_v10 }
 0x40a   :  { %1012 = vmatprep.subr.bf16.mxu1 %v1262_v0 }
 0x40d   :  { %1013 = vmatpush3.bf16.msra.mxu1 %v1393_v12 }
 0x40e   :  { %1014 = vmatprep.subr.bf16.mxu1 %v1262_v0 }
 0x411   :  { %1015 = vmatpush3.bf16.msra.mxu1 %v1402_v13 }
 0x412   :  { %1016 = vmatprep.subr.bf16.mxu1 %v1262_v0 }
 0x415   :  { %1017 = vmatpush3.bf16.msra.mxu1 %v1408_v14 }
 0x416   :  { %1018 = vmatprep.subr.bf16.mxu1 %v1262_v0 }
 0x419   :  { %1019 = vmatpush3.bf16.msra.mxu1 %v1414_v15 }
 0x41a   :  { %1044 = vmatprep.subr.bf16.mxu1 %v1262_v0 }
 0x4cf   :  { %v469_v9 = vpop.f32.mrb[8].mxu1 }
 0x4d0   :  { %v475_v11 = vadd.f32 %v469_v9, %v174_v8  ;;  %v982_v16 = vpop.f32.mrb[9].mxu1 }
 0x4d1   :  { %v472_v17 = vpop.f32.mrb[10].mxu1 }
 0x4d2   :  { %v476_v18 = vpack.c.bf16 %v475_v11, %v475_v11  ;;  %v983_v19 = vpop.f32.mrb[11].mxu1 }
 0x4d4   :  { %1102 = vtanh.bf16 %v476_v18 }
 0x4df   :  { %v1103_v20 = vpop.eup %1102 }
 0x4e0   :  { %v478_v21 = vunpack.c.l.bf16 %v1103_v20  ;;  %1001 = vmatmul.mubr.bf16.vlgmr.msra.gmra.mrb[16].mxu0 %v1103_v20 }
 0x4e1   :  { %1025 = vmatpush3.bf16.msra.mxu0 %v1377_v1  ;;  %1040 = vmatprep.mubr.msk.bf16.mxu0 %vm1263_vm0, %v1262_v0  ;;  %v177_v1 = vadd.f32 %v1457_v27, %v1484_v40  ;;  %v1091_v40 = vld [vmem:[#allocation8 + $0x28] sm:$0xff]  }
 0x4e2   :  { %480 = vst [vmem:[#allocation10 + $0x20] sm:$0xff] %v478_v21  ;;  %1026 = vmatprep.subr.bf16.mxu0 %v1262_v0 }
 0x4e5   :  { %1027 = vmatpush3.bf16.msra.mxu0 %v1380_v2 }
 0x4e6   :  { %1028 = vmatprep.subr.bf16.mxu0 %v1262_v0 }
 0x4e9   :  { %1029 = vmatpush3.bf16.msra.mxu0 %v1383_v3 }
 0x4ea   :  { %1030 = vmatprep.subr.bf16.mxu0 %v1262_v0 }
 0x4ed   :  { %1031 = vmatpush3.bf16.msra.mxu0 %v1388_v10 }
 0x4ee   :  { %1032 = vmatprep.subr.bf16.mxu0 %v1262_v0 }
 0x4f1   :  { %1033 = vmatpush3.bf16.msra.mxu0 %v1393_v12 }
 0x4f2   :  { %1034 = vmatprep.subr.bf16.mxu0 %v1262_v0 }
 0x4f5   :  { %1035 = vmatpush3.bf16.msra.mxu0 %v1402_v13 }
 0x4f6   :  { %1036 = vmatprep.subr.bf16.mxu0 %v1262_v0 }
 0x4f9   :  { %1037 = vmatpush3.bf16.msra.mxu0 %v1408_v14  ;;  %v1086_v14 = vld [vmem:[#allocation8] sm:$0xff]  }
 0x4fa   :  { %1038 = vmatprep.subr.bf16.mxu0 %v1262_v0 }
 0x4fd   :  { %1039 = vmatpush3.bf16.msra.mxu0 %v1414_v15  ;;  %v1087_v15 = vld [vmem:[#allocation8 + $0x8] sm:$0xff]  }
 0x5b3   :  { %v515_v2 = vpop.f32.mrb[16].mxu0 }
 0x5b4   :  { %v521_v3 = vadd.f32 %v515_v2, %v177_v1  ;;  %v1002_v10 = vpop.f32.mrb[17].mxu0 }
 0x5b5   :  { %v518_v22 = vpop.f32.mrb[18].mxu0 }
 0x5b6   :  { %v522_v12 = vpack.c.bf16 %v521_v3, %v521_v3  ;;  %v1003_v23 = vpop.f32.mrb[19].mxu0 }
 0x5b8   :  { %1104 = vtanh.bf16 %v522_v12 }
 0x5c3   :  { %v1105_v24 = vpop.eup %1104 }
 0x5c4   :  { %v524_v13 = vunpack.c.l.bf16 %v1105_v24  ;;  %1021 = vmatmul.mubr.bf16.vlgmr.msra.gmra.mrb[12].mxu1 %v1105_v24 }
 0x5c5   :  { %1060 = vmatprep.mubr.msk.bf16.mxu1 %vm1263_vm0, %v1262_v0  ;;  %1045 = vmatpush3.bf16.msra.mxu1 %v1086_v14 }
 0x5c6   :  { %526 = vst [vmem:[#allocation10 + $0x28] sm:$0xff] %v524_v13  ;;  %1046 = vmatprep.subr.bf16.mxu1 %v1262_v0 }
 0x5c9   :  { %1047 = vmatpush3.bf16.msra.mxu1 %v1087_v15 }
 0x5ca   :  { %1048 = vmatprep.subr.bf16.mxu1 %v1262_v0 }
 0x5cd   :  { %1049 = vmatpush3.bf16.msra.mxu1 %v1088_v25 }
 0x5ce   :  { %1050 = vmatprep.subr.bf16.mxu1 %v1262_v0 }
 0x5d1   :  { %1051 = vmatpush3.bf16.msra.mxu1 %v1089_v26 }
 0x5d2   :  { %1052 = vmatprep.subr.bf16.mxu1 %v1262_v0 }
 0x5d5   :  { %1053 = vmatpush3.bf16.msra.mxu1 %v1090_v38 }
 0x5d6   :  { %1054 = vmatprep.subr.bf16.mxu1 %v1262_v0 }
 0x5d9   :  { %1055 = vmatpush3.bf16.msra.mxu1 %v1091_v40 }
 0x5da   :  { %1056 = vmatprep.subr.bf16.mxu1 %v1262_v0 }
 0x5dd   :  { %1057 = vmatpush3.bf16.msra.mxu1 %v1092_v37 }
 0x5de   :  { %1058 = vmatprep.subr.bf16.mxu1 %v1262_v0 }
 0x5e1   :  { %1059 = vmatpush3.bf16.msra.mxu1 %v1093_v41 }
 0x697   :  { %v561_v29 = vpop.f32.mrb[12].mxu1 }
 0x698   :  { %v567_v30 = vadd.f32 %v561_v29, %v182_v28  ;;  %v1022_v31 = vpop.f32.mrb[13].mxu1 }
 0x699   :  { %v564_v32 = vpop.f32.mrb[14].mxu1 }
 0x69a   :  { %v568_v33 = vpack.c.bf16 %v567_v30, %v567_v30  ;;  %v1023_v34 = vpop.f32.mrb[15].mxu1 }
 0x69c   :  { %1106 = vtanh.bf16 %v568_v33 }
 0x6a7   :  { %v1107_v35 = vpop.eup %1106 }
 0x6a8   :  { %v570_v36 = vunpack.c.l.bf16 %v1107_v35  ;;  %1041 = vmatmul.mubr.bf16.vlgmr.msra.gmra.mrb[20].mxu0 %v1107_v35 }
 0x6aa   :  { %572 = vst [vmem:[#allocation10 + $0x30] sm:$0xff] %v570_v36 }
 0x77b   :  { %v607_v43 = vpop.f32.mrb[20].mxu0 }
 0x77c   :  { %v613_v44 = vadd.f32 %v607_v43, %v185_v42  ;;  %v1042_v45 = vpop.f32.mrb[21].mxu0 }
 0x77d   :  { %v610_v46 = vpop.f32.mrb[22].mxu0 }
 0x77e   :  { %v614_v47 = vpack.c.bf16 %v613_v44, %v613_v44  ;;  %v1043_v48 = vpop.f32.mrb[23].mxu0 }
 0x780   :  { %1108 = vtanh.bf16 %v614_v47 }
 0x78b   :  { %v1109_v49 = vpop.eup %1108 }
 0x78c   :  { %v616_v50 = vunpack.c.l.bf16 %v1109_v49  ;;  %1061 = vmatmul.mubr.bf16.vlgmr.msra.gmra.mrb[16].mxu1 %v1109_v49 }
 0x78e   :  { %618 = vst [vmem:[#allocation10 + $0x38] sm:$0xff] %v616_v50 }
 0x78f   :  { %1211 = shalt.err (!%p1208_p8)
}
 0x790   :  { %s1212_s10 = scalar_lea.hbm %s1615_s6, 1024 }
 0x791   :  { %p1213_p9 = scmp.ne.s32.totalorder %s1615_s6, %s1212_s10  ;;  %p1216_p10 = scmp.lt.u32.totalorder %s1212_s10, %s1615_s6 }
 0x793   :  { %p1218_p11 = pnand %p1216_p10, %p1213_p9 }
 0x795   :  { %1221 = shalt.err (!%p1218_p11)
}
 0x796   :  { %743 = dma.vmem_to_hbm [thread:$0]  %s738_s12, 1024, %s1615_s6, [#allocation4], %s1258_s1, %s1258_s1, %s1259_s25  }
 0x797   :  { %v779_v0 = vld [vmem:[%s1614_s5] ss:$0 sm:$0xff]  ;;  %s1266_s20 = smov [#allocation11]  }
 0x798   :  { %s750_s21 = sshll.u32 %s1266_s20, 4  ;;  %s751_s21 = int_to_ptr.vmem [resolvable:$true] %s750_s21 }
 0x799   :  { %s1222_s22 = scalar_lea.vmem %s751_s21, 128  ;;  %p1227_p13 = scmp.lt.s32.totalorder %s751_s21, %s751_s21 }
 0x79a   :  { %p1223_p12 = scmp.ne.s32.totalorder %s751_s21, %s1222_s22  ;;  %p1228_p0 = scmp.lt.s32.totalorder %s1222_s22, %s1222_s22 }
 0x79c   :  { %p1229_p1 = por %p1228_p0, %p1227_p13 }
 0x79e   :  { %p1230_p2 = pnand %p1229_p1, %p1223_p12 }
 0x85f   :  { %v724_v27 = vpop.f32.mrb[16].mxu1 }
 0x860   :  { %v725_v39 = vadd.f32 %v779_v0, %v724_v27  ;;  %v1062_v51 = vpop.f32.mrb[17].mxu1 }
 0x861   :  { %v727_v52 = vpop.f32.mrb[18].mxu1 }
 0x862   :  { %1110 = vtanh.f32 %v725_v39  ;;  %v1063_v53 = vpop.f32.mrb[19].mxu1 }
 0x86c   :  { %v1111_v54 = vpop.eup %1110 }
 0x86d   :  { %731 = vst [vmem:[#allocation11] sm:$0xff] %v1111_v54 }
 0x86e   :  { %1233 = shalt.err (!%p1230_p2)
}
 0x86f   :  { %s1234_s1 = scalar_lea.hbm %s1616_s7, 128 }
 0x870   :  { %p1235_p3 = scmp.ne.s32.totalorder %s1616_s7, %s1234_s1  ;;  %p1238_p4 = scmp.lt.u32.totalorder %s1234_s1, %s1616_s7 }
 0x872   :  { %p1240_p5 = pnand %p1238_p4, %p1235_p3 }
 0x874   :  { %1243 = shalt.err (!%p1240_p5)
}
 0x875   :  { %753 = dma.vmem_to_hbm [thread:$0]  %s751_s21, 128, %s1616_s7, [#allocation12]  }
 0x876   :  { %1250 = dma.done.wait [#allocation4], 1024  }
 0x877   :  { %1251 = vsyncadd [#allocation4], 4294966272 }
 0x878   :  { %1252 = dma.done.wait [#allocation12], 128  }
 0x879   :  { %1253 = vsyncadd [#allocation12], 4294967168 }
 0x87a   :  { %760 = vsyncpa [#allocation3], 1 }
 0x87b   :  { %761 = vsyncpa [#allocation6], 1 }
 0x87c   :  { %762 = vsyncpa [#allocation9], 1 }
 0x87d   :  { %763 = vsyncpa [#allocation4], 1 }
 0x87e   :  { %764 = vsyncpa [#allocation12], 1 }

</bundles_post_ra>
